<compile_context>
chip_gen: v6e
topology: v6e:2x2x1
jax: 0.10.0
libtpu: 0.0.40
codegen_flags: <defaults>
</compile_context>

<pallas_src>
import jax
import jax.numpy as jnp
from jax.experimental import pallas as pl
from jax.experimental.pallas import tpu as pltpu

# ---------------- model hyper-parameters (small, consistent with the module) ----
VOCAB_SIZE = 50
WORD_SIZE = 16            # embedding row width (LSTM input size)
SEQ_LEN = 8               # sequence_length
HIDDEN = 32               # module's "embedding_size" == LSTM hidden size
BATCH = 2
PAD_IDX = 0
NUM_CLASSES = 2
FLATTEN_DIM = 1 * SEQ_LEN * HIDDEN        # ndirections * seq_len * hidden = 256

B_PAD = 8                                 # pad batch to the f32 sublane count
VOCAB_PAD = 64                            # sublane-aligned vocab rows
OUT_WIDTH = 128                           # lane-dense packed output width


# ---------------------------- fused forward kernel -------------------------------
def _fused_forward_kernel(
    ids_ref,         # (S*B_PAD, 1) int32 token ids (t-major), VMEM
    embproj_ref,     # (VOCAB_PAD, 4H) f32 : emb @ W_ih^T (PAD_IDX row is zero)
    whh_ref,         # (H, 4H)
    bias_ref,        # (1, 4H) = b_ih + b_hh
    w1_ref, b1_ref,  # (FLATTEN_DIM, 32), (1, 32)
    w2_ref, b2_ref,  # (32, 32), (1, 32)
    w3_ref, b3_ref,  # (32, 32), (1, 32)
    w4_ref, b4_ref,  # (32, NUM_CLASSES), (1, NUM_CLASSES)
    out_ref,         # (B_PAD, OUT_WIDTH): [logits(2) | h_n(32) | c_n(32) | 0-pad]
):
    H = HIDDEN
    SB = SEQ_LEN * B_PAD

    # ---- embedding lookup + input projection hoisted out of the recurrence ----
    # one-hot (SB, VOCAB_PAD) @ emb_proj (VOCAB_PAD, 4H) -> gx for every (t, b).
    ids = ids_ref[...]                                              # (SB, 1)
    vocab_iota = jax.lax.broadcasted_iota(jnp.int32, (SB, VOCAB_PAD), 1)
    one_hot = (ids == vocab_iota).astype(jnp.float32)               # (SB, VOCAB_PAD)
    gx_all = jnp.dot(one_hot, embproj_ref[...],
                     preferred_element_type=jnp.float32)            # (SB, 4H)

    whh = whh_ref[...]
    bias = bias_ref[...]

    # sigmoid(x) = 0.5*tanh(x/2) + 0.5 : one full-width tanh activates the whole
    # (B_PAD, 4H) gates block; lane groups [i, f, g, o] get per-lane scale/shift.
    ones_h = jnp.ones((1, H), jnp.float32)
    zeros_h = jnp.zeros((1, H), jnp.float32)
    g_scale = jnp.concatenate([0.5 * ones_h, 0.5 * ones_h, ones_h, 0.5 * ones_h], axis=1)
    g_shift = jnp.concatenate([0.5 * ones_h, 0.5 * ones_h, zeros_h, 0.5 * ones_h], axis=1)

    h = jnp.zeros((B_PAD, H), jnp.float32)
    c = jnp.zeros((B_PAD, H), jnp.float32)
    hs = []
    for t in range(SEQ_LEN):                     # fully unrolled recurrence (S = 8)
        gx = gx_all[t * B_PAD:(t + 1) * B_PAD, :]        # static, sublane-aligned
        gates = gx + jnp.dot(h, whh, preferred_element_type=jnp.float32) + bias
        act = g_scale * jnp.tanh(gates * g_scale) + g_shift      # i,f,o = sigmoid; g = tanh
        i_g = act[:, 0 * H:1 * H]
        f_g = act[:, 1 * H:2 * H]
        g_g = act[:, 2 * H:3 * H]
        o_g = act[:, 3 * H:4 * H]
        c = f_g * c + i_g * g_g
        h = o_g * jnp.tanh(c)
        hs.append(h)

    # permute(1,0,2) + flatten(1) done in-register: lane-dense (B_PAD, S*H) = (8, 256).
    flat = jnp.concatenate(hs, axis=1)

    z = jnp.dot(flat, w1_ref[...], preferred_element_type=jnp.float32) + b1_ref[...]
    z = jnp.maximum(z, 0.0)
    # Dropout(0.5): identity in eval mode.
    z = jnp.dot(z, w2_ref[...], preferred_element_type=jnp.float32) + b2_ref[...]
    z = jnp.maximum(z, 0.0)
    # Dropout(0.5): identity in eval mode.
    z = jnp.dot(z, w3_ref[...], preferred_element_type=jnp.float32) + b3_ref[...]
    z = jnp.maximum(z, 0.0)
    logits = jnp.dot(z, w4_ref[...], preferred_element_type=jnp.float32) + b4_ref[...]

    # Pack logits / h_n / c_n into one lane-dense (8, 128) slab: single unmasked store.
    pad = jnp.zeros((B_PAD, OUT_WIDTH - NUM_CLASSES - 2 * H), jnp.float32)
    out_ref[...] = jnp.concatenate([logits, h, c, pad], axis=1)


def fused_forward(ids_col, kp):
    """ids_col: (S*B_PAD, 1) int32.  Returns packed (B_PAD, OUT_WIDTH) f32."""
    vmem = pl.BlockSpec(memory_space=pltpu.MemorySpace.VMEM)
    return pl.pallas_call(
        _fused_forward_kernel,
        out_shape=jax.ShapeDtypeStruct((B_PAD, OUT_WIDTH), jnp.float32),
        in_specs=[vmem] * 12,
        out_specs=vmem,
    )(ids_col, kp["emb_proj"], kp["whh_t"], kp["bias"],
      kp["w1"], kp["b1"], kp["w2"], kp["b2"],
      kp["w3"], kp["b3"], kp["w4"], kp["b4"])


# ---------------------------- parameter construction -----------------------------
def init_params(key):
    """PyTorch-layout parameters (Embedding, LSTM (4H,in) stacked [i,f,g,o], dense head)."""
    ks = jax.random.split(key, 13)
    scale = 0.1
    H, W = HIDDEN, WORD_SIZE
    emb = scale * jax.random.normal(ks[0], (VOCAB_SIZE, W), jnp.float32)
    emb = emb.at[PAD_IDX].set(0.0)                      # padding_idx row zeroed
    w_ih = scale * jax.random.normal(ks[1], (4 * H, W), jnp.float32)
    w_hh = scale * jax.random.normal(ks[2], (4 * H, H), jnp.float32)
    b_ih = scale * jax.random.normal(ks[3], (4 * H,), jnp.float32)
    b_hh = scale * jax.random.normal(ks[4], (4 * H,), jnp.float32)

    def lin(kw, kb, n_in, n_out):
        return (scale * jax.random.normal(kw, (n_out, n_in), jnp.float32),
                scale * jax.random.normal(kb, (n_out,), jnp.float32))

    dense = (lin(ks[5], ks[6], FLATTEN_DIM, 32),
             lin(ks[7], ks[8], 32, 32),
             lin(ks[9], ks[10], 32, 32),
             lin(ks[11], ks[12], 32, NUM_CLASSES))
    return dict(emb=emb, w_ih=w_ih, w_hh=w_hh, b_ih=b_ih, b_hh=b_hh, dense=dense)


def pack_params(p):
    """One-time transform to kernel-ready layout (input projection folded into the table)."""
    emb_pad = jnp.pad(p["emb"], ((0, VOCAB_PAD - VOCAB_SIZE), (0, 0)))
    emb_proj = jnp.dot(emb_pad, p["w_ih"].T)                     # (VOCAB_PAD, 4H), 2-D
    d = p["dense"]
    return dict(
        emb_proj=emb_proj.astype(jnp.float32),
        whh_t=p["w_hh"].T.astype(jnp.float32),                   # (H, 4H)
        bias=(p["b_ih"] + p["b_hh"])[None, :].astype(jnp.float32),
        w1=d[0][0].T, b1=d[0][1][None, :],
        w2=d[1][0].T, b2=d[1][1][None, :],
        w3=d[2][0].T, b3=d[2][1][None, :],
        w4=d[3][0].T, b4=d[3][1][None, :],
    )


# ---------------------------- full forward ---------------------------------------
@jax.jit
def sentiment_net_forward(text, kparams):
    """text: (S, B) int32 token ids. Returns (logits (B,2), (h_n (1,B,H), c_n (1,B,H)))."""
    S, B = text.shape
    text_pad = jnp.pad(text, ((0, 0), (0, B_PAD - B)), constant_values=PAD_IDX)
    ids_col = text_pad.reshape(S * B_PAD, 1).astype(jnp.int32)   # t-major column
    packed = fused_forward(ids_col, kparams)
    logits = packed[:B, 0:NUM_CLASSES]
    h_n = packed[:B, NUM_CLASSES:NUM_CLASSES + HIDDEN]
    c_n = packed[:B, NUM_CLASSES + HIDDEN:NUM_CLASSES + 2 * HIDDEN]
    return logits, (h_n[None], c_n[None])


# ---------------------------- pure-JAX reference ----------------------------------
def reference_forward(text, params):
    """Non-Pallas replica of the PyTorch forward, for validation."""
    H = HIDDEN
    B = text.shape[1]
    embedded = jnp.take(params["emb"], text, axis=0)            # (S, B, W)
    wih, whh = params["w_ih"], params["w_hh"]
    bias = params["b_ih"] + params["b_hh"]

    def step(carry, x_t):
        h, c = carry
        gates = x_t @ wih.T + h @ whh.T + bias
        i = jax.nn.sigmoid(gates[:, 0 * H:1 * H])
        f = jax.nn.sigmoid(gates[:, 1 * H:2 * H])
        g = jnp.tanh(gates[:, 2 * H:3 * H])
        o = jax.nn.sigmoid(gates[:, 3 * H:4 * H])
        c = f * c + i * g
        h = o * jnp.tanh(c)
        return (h, c), h

    init = (jnp.zeros((B, H), jnp.float32), jnp.zeros((B, H), jnp.float32))
    (h_n, c_n), outs = jax.lax.scan(step, init, embedded)
    flat = jnp.transpose(outs, (1, 0, 2)).reshape(B, -1)
    z = flat
    for w, b in params["dense"][:-1]:
        z = jnp.maximum(z @ w.T + b, 0.0)
    w, b = params["dense"][-1]
    return z @ w.T + b, (h_n[None], c_n[None])


if __name__ == "__main__":
    key = jax.random.PRNGKey(0)
    pkey, tkey = jax.random.split(key)
    params = init_params(pkey)
    kparams = pack_params(params)
    text = jax.random.randint(tkey, (SEQ_LEN, BATCH), 0, VOCAB_SIZE, dtype=jnp.int32)

    logits, (h_n, c_n) = sentiment_net_forward(text, kparams)
    jax.block_until_ready((logits, h_n, c_n))

    assert logits.shape == (BATCH, NUM_CLASSES)
    assert h_n.shape == (1, BATCH, HIDDEN) and c_n.shape == (1, BATCH, HIDDEN)

    # Cross-check the fused kernel against the pure-JAX reference (loose f32 tolerance).
    ref_logits, (ref_hn, ref_cn) = reference_forward(text, params)
    assert jnp.allclose(logits, ref_logits, atol=1e-2, rtol=1e-2)
    assert jnp.allclose(h_n, ref_hn, atol=1e-2, rtol=1e-2)
    assert jnp.allclose(c_n, ref_cn, atol=1e-2, rtol=1e-2)

    print("KERNEL_OK")
</pallas_src>

<mosaic_0001>
module attributes {stable_mosaic.version = 11 : i64} {
  func.func @_fused_forward_kernel(%arg0: memref<64x1xi32, #tpu.memory_space<vmem>>, %arg1: memref<64x128xf32, #tpu.memory_space<vmem>>, %arg2: memref<32x128xf32, #tpu.memory_space<vmem>>, %arg3: memref<1x128xf32, #tpu.memory_space<vmem>>, %arg4: memref<256x32xf32, #tpu.memory_space<vmem>>, %arg5: memref<1x32xf32, #tpu.memory_space<vmem>>, %arg6: memref<32x32xf32, #tpu.memory_space<vmem>>, %arg7: memref<1x32xf32, #tpu.memory_space<vmem>>, %arg8: memref<32x32xf32, #tpu.memory_space<vmem>>, %arg9: memref<1x32xf32, #tpu.memory_space<vmem>>, %arg10: memref<32x2xf32, #tpu.memory_space<vmem>>, %arg11: memref<1x2xf32, #tpu.memory_space<vmem>>, %arg12: memref<8x128xf32, #tpu.memory_space<vmem>>) attributes {dimension_semantics = [], scalar_prefetch = 0 : i64, scratch_operands = 0 : i64, tpu.core_type = #tpu.core_type<tc>} {
    %c0 = arith.constant 0 : index
    %c0_0 = arith.constant 0 : index
    %0 = vector.load %arg0[%c0, %c0_0] : memref<64x1xi32, #tpu.memory_space<vmem>>, vector<64x1xi32>
    %1 = tpu.iota {dimensions = array<i32: 1>} : vector<64x64xi32>
    %2 = vector.broadcast %0 : vector<64x1xi32> to vector<64x64xi32>
    %3 = arith.cmpi eq, %2, %1 : vector<64x64xi32>
    %4 = arith.extui %3 : vector<64x64xi1> to vector<64x64xi32>
    %5 = arith.sitofp %4 : vector<64x64xi32> to vector<64x64xf32>
    %c0_1 = arith.constant 0 : index
    %c0_2 = arith.constant 0 : index
    %6 = vector.load %arg1[%c0_1, %c0_2] : memref<64x128xf32, #tpu.memory_space<vmem>>, vector<64x128xf32>
    %cst = arith.constant dense<0.000000e+00> : vector<64x128xf32>
    %7 = tpu.matmul %5, %6, %cst {dimension_numbers = #tpu.dot_dimension_numbers<[1], [0], [0], [1], [0, 0, 1, 1], [], []>} : vector<64x64xf32>, vector<64x128xf32>, vector<64x128xf32> -> vector<64x128xf32>
    %c0_3 = arith.constant 0 : index
    %c0_4 = arith.constant 0 : index
    %8 = vector.load %arg2[%c0_3, %c0_4] : memref<32x128xf32, #tpu.memory_space<vmem>>, vector<32x128xf32>
    %c0_5 = arith.constant 0 : index
    %c0_6 = arith.constant 0 : index
    %9 = vector.load %arg3[%c0_5, %c0_6] : memref<1x128xf32, #tpu.memory_space<vmem>>, vector<1x128xf32>
    %cst_7 = arith.constant 1.000000e+00 : f32
    %10 = vector.broadcast %cst_7 : f32 to vector<1x32xf32>
    %cst_8 = arith.constant 0.000000e+00 : f32
    %11 = vector.broadcast %cst_8 : f32 to vector<1x32xf32>
    %cst_9 = arith.constant 5.000000e-01 : f32
    %12 = vector.broadcast %cst_9 : f32 to vector<1x32xf32>
    %13 = arith.mulf %12, %10 : vector<1x32xf32>
    %cst_10 = arith.constant 5.000000e-01 : f32
    %14 = vector.broadcast %cst_10 : f32 to vector<1x32xf32>
    %15 = arith.mulf %14, %10 : vector<1x32xf32>
    %cst_11 = arith.constant 5.000000e-01 : f32
    %16 = vector.broadcast %cst_11 : f32 to vector<1x32xf32>
    %17 = arith.mulf %16, %10 : vector<1x32xf32>
    %18 = tpu.concatenate %13, %15, %10, %17 in 1 : vector<1x32xf32>, vector<1x32xf32>, vector<1x32xf32>, vector<1x32xf32> -> vector<1x128xf32>
    %cst_12 = arith.constant 5.000000e-01 : f32
    %19 = vector.broadcast %cst_12 : f32 to vector<1x32xf32>
    %20 = arith.mulf %19, %10 : vector<1x32xf32>
    %cst_13 = arith.constant 5.000000e-01 : f32
    %21 = vector.broadcast %cst_13 : f32 to vector<1x32xf32>
    %22 = arith.mulf %21, %10 : vector<1x32xf32>
    %cst_14 = arith.constant 5.000000e-01 : f32
    %23 = vector.broadcast %cst_14 : f32 to vector<1x32xf32>
    %24 = arith.mulf %23, %10 : vector<1x32xf32>
    %25 = tpu.concatenate %20, %22, %11, %24 in 1 : vector<1x32xf32>, vector<1x32xf32>, vector<1x32xf32>, vector<1x32xf32> -> vector<1x128xf32>
    %cst_15 = arith.constant 0.000000e+00 : f32
    %26 = vector.broadcast %cst_15 : f32 to vector<8x32xf32>
    %cst_16 = arith.constant 0.000000e+00 : f32
    %27 = vector.broadcast %cst_16 : f32 to vector<8x32xf32>
    %28 = vector.extract_strided_slice %7 {offsets = [0, 0], sizes = [8, 128], strides = [1, 1]} : vector<64x128xf32> to vector<8x128xf32>
    %cst_17 = arith.constant dense<0.000000e+00> : vector<8x128xf32>
    %29 = tpu.matmul %26, %8, %cst_17 {dimension_numbers = #tpu.dot_dimension_numbers<[1], [0], [0], [1], [0, 0, 1, 1], [], []>} : vector<8x32xf32>, vector<32x128xf32>, vector<8x128xf32> -> vector<8x128xf32>
    %30 = arith.addf %28, %29 : vector<8x128xf32>
    %31 = vector.broadcast %9 : vector<1x128xf32> to vector<8x128xf32>
    %32 = arith.addf %30, %31 : vector<8x128xf32>
    %33 = vector.broadcast %18 : vector<1x128xf32> to vector<8x128xf32>
    %34 = arith.mulf %32, %33 : vector<8x128xf32>
    %35 = math.tanh %34 : vector<8x128xf32>
    %36 = vector.broadcast %18 : vector<1x128xf32> to vector<8x128xf32>
    %37 = arith.mulf %36, %35 : vector<8x128xf32>
    %38 = vector.broadcast %25 : vector<1x128xf32> to vector<8x128xf32>
    %39 = arith.addf %37, %38 : vector<8x128xf32>
    %40 = vector.extract_strided_slice %39 {offsets = [0, 0], sizes = [8, 32], strides = [1, 1]} : vector<8x128xf32> to vector<8x32xf32>
    %41 = vector.extract_strided_slice %39 {offsets = [0, 32], sizes = [8, 32], strides = [1, 1]} : vector<8x128xf32> to vector<8x32xf32>
    %42 = vector.extract_strided_slice %39 {offsets = [0, 64], sizes = [8, 32], strides = [1, 1]} : vector<8x128xf32> to vector<8x32xf32>
    %43 = vector.extract_strided_slice %39 {offsets = [0, 96], sizes = [8, 32], strides = [1, 1]} : vector<8x128xf32> to vector<8x32xf32>
    %44 = arith.mulf %41, %27 : vector<8x32xf32>
    %45 = arith.mulf %40, %42 : vector<8x32xf32>
    %46 = arith.addf %44, %45 : vector<8x32xf32>
    %47 = math.tanh %46 : vector<8x32xf32>
    %48 = arith.mulf %43, %47 : vector<8x32xf32>
    %49 = vector.extract_strided_slice %7 {offsets = [8, 0], sizes = [8, 128], strides = [1, 1]} : vector<64x128xf32> to vector<8x128xf32>
    %cst_18 = arith.constant dense<0.000000e+00> : vector<8x128xf32>
    %50 = tpu.matmul %48, %8, %cst_18 {dimension_numbers = #tpu.dot_dimension_numbers<[1], [0], [0], [1], [0, 0, 1, 1], [], []>} : vector<8x32xf32>, vector<32x128xf32>, vector<8x128xf32> -> vector<8x128xf32>
    %51 = arith.addf %49, %50 : vector<8x128xf32>
    %52 = vector.broadcast %9 : vector<1x128xf32> to vector<8x128xf32>
    %53 = arith.addf %51, %52 : vector<8x128xf32>
    %54 = vector.broadcast %18 : vector<1x128xf32> to vector<8x128xf32>
    %55 = arith.mulf %53, %54 : vector<8x128xf32>
    %56 = math.tanh %55 : vector<8x128xf32>
    %57 = vector.broadcast %18 : vector<1x128xf32> to vector<8x128xf32>
    %58 = arith.mulf %57, %56 : vector<8x128xf32>
    %59 = vector.broadcast %25 : vector<1x128xf32> to vector<8x128xf32>
    %60 = arith.addf %58, %59 : vector<8x128xf32>
    %61 = vector.extract_strided_slice %60 {offsets = [0, 0], sizes = [8, 32], strides = [1, 1]} : vector<8x128xf32> to vector<8x32xf32>
    %62 = vector.extract_strided_slice %60 {offsets = [0, 32], sizes = [8, 32], strides = [1, 1]} : vector<8x128xf32> to vector<8x32xf32>
    %63 = vector.extract_strided_slice %60 {offsets = [0, 64], sizes = [8, 32], strides = [1, 1]} : vector<8x128xf32> to vector<8x32xf32>
    %64 = vector.extract_strided_slice %60 {offsets = [0, 96], sizes = [8, 32], strides = [1, 1]} : vector<8x128xf32> to vector<8x32xf32>
    %65 = arith.mulf %62, %46 : vector<8x32xf32>
    %66 = arith.mulf %61, %63 : vector<8x32xf32>
    %67 = arith.addf %65, %66 : vector<8x32xf32>
    %68 = math.tanh %67 : vector<8x32xf32>
    %69 = arith.mulf %64, %68 : vector<8x32xf32>
    %70 = vector.extract_strided_slice %7 {offsets = [16, 0], sizes = [8, 128], strides = [1, 1]} : vector<64x128xf32> to vector<8x128xf32>
    %cst_19 = arith.constant dense<0.000000e+00> : vector<8x128xf32>
    %71 = tpu.matmul %69, %8, %cst_19 {dimension_numbers = #tpu.dot_dimension_numbers<[1], [0], [0], [1], [0, 0, 1, 1], [], []>} : vector<8x32xf32>, vector<32x128xf32>, vector<8x128xf32> -> vector<8x128xf32>
    %72 = arith.addf %70, %71 : vector<8x128xf32>
    %73 = vector.broadcast %9 : vector<1x128xf32> to vector<8x128xf32>
    %74 = arith.addf %72, %73 : vector<8x128xf32>
    %75 = vector.broadcast %18 : vector<1x128xf32> to vector<8x128xf32>
    %76 = arith.mulf %74, %75 : vector<8x128xf32>
    %77 = math.tanh %76 : vector<8x128xf32>
    %78 = vector.broadcast %18 : vector<1x128xf32> to vector<8x128xf32>
    %79 = arith.mulf %78, %77 : vector<8x128xf32>
    %80 = vector.broadcast %25 : vector<1x128xf32> to vector<8x128xf32>
    %81 = arith.addf %79, %80 : vector<8x128xf32>
    %82 = vector.extract_strided_slice %81 {offsets = [0, 0], sizes = [8, 32], strides = [1, 1]} : vector<8x128xf32> to vector<8x32xf32>
    %83 = vector.extract_strided_slice %81 {offsets = [0, 32], sizes = [8, 32], strides = [1, 1]} : vector<8x128xf32> to vector<8x32xf32>
    %84 = vector.extract_strided_slice %81 {offsets = [0, 64], sizes = [8, 32], strides = [1, 1]} : vector<8x128xf32> to vector<8x32xf32>
    %85 = vector.extract_strided_slice %81 {offsets = [0, 96], sizes = [8, 32], strides = [1, 1]} : vector<8x128xf32> to vector<8x32xf32>
    %86 = arith.mulf %83, %67 : vector<8x32xf32>
    %87 = arith.mulf %82, %84 : vector<8x32xf32>
    %88 = arith.addf %86, %87 : vector<8x32xf32>
    %89 = math.tanh %88 : vector<8x32xf32>
    %90 = arith.mulf %85, %89 : vector<8x32xf32>
    %91 = vector.extract_strided_slice %7 {offsets = [24, 0], sizes = [8, 128], strides = [1, 1]} : vector<64x128xf32> to vector<8x128xf32>
    %cst_20 = arith.constant dense<0.000000e+00> : vector<8x128xf32>
    %92 = tpu.matmul %90, %8, %cst_20 {dimension_numbers = #tpu.dot_dimension_numbers<[1], [0], [0], [1], [0, 0, 1, 1], [], []>} : vector<8x32xf32>, vector<32x128xf32>, vector<8x128xf32> -> vector<8x128xf32>
    %93 = arith.addf %91, %92 : vector<8x128xf32>
    %94 = vector.broadcast %9 : vector<1x128xf32> to vector<8x128xf32>
    %95 = arith.addf %93, %94 : vector<8x128xf32>
    %96 = vector.broadcast %18 : vector<1x128xf32> to vector<8x128xf32>
    %97 = arith.mulf %95, %96 : vector<8x128xf32>
    %98 = math.tanh %97 : vector<8x128xf32>
    %99 = vector.broadcast %18 : vector<1x128xf32> to vector<8x128xf32>
    %100 = arith.mulf %99, %98 : vector<8x128xf32>
    %101 = vector.broadcast %25 : vector<1x128xf32> to vector<8x128xf32>
    %102 = arith.addf %100, %101 : vector<8x128xf32>
    %103 = vector.extract_strided_slice %102 {offsets = [0, 0], sizes = [8, 32], strides = [1, 1]} : vector<8x128xf32> to vector<8x32xf32>
    %104 = vector.extract_strided_slice %102 {offsets = [0, 32], sizes = [8, 32], strides = [1, 1]} : vector<8x128xf32> to vector<8x32xf32>
    %105 = vector.extract_strided_slice %102 {offsets = [0, 64], sizes = [8, 32], strides = [1, 1]} : vector<8x128xf32> to vector<8x32xf32>
    %106 = vector.extract_strided_slice %102 {offsets = [0, 96], sizes = [8, 32], strides = [1, 1]} : vector<8x128xf32> to vector<8x32xf32>
    %107 = arith.mulf %104, %88 : vector<8x32xf32>
    %108 = arith.mulf %103, %105 : vector<8x32xf32>
    %109 = arith.addf %107, %108 : vector<8x32xf32>
    %110 = math.tanh %109 : vector<8x32xf32>
    %111 = arith.mulf %106, %110 : vector<8x32xf32>
    %112 = vector.extract_strided_slice %7 {offsets = [32, 0], sizes = [8, 128], strides = [1, 1]} : vector<64x128xf32> to vector<8x128xf32>
    %cst_21 = arith.constant dense<0.000000e+00> : vector<8x128xf32>
    %113 = tpu.matmul %111, %8, %cst_21 {dimension_numbers = #tpu.dot_dimension_numbers<[1], [0], [0], [1], [0, 0, 1, 1], [], []>} : vector<8x32xf32>, vector<32x128xf32>, vector<8x128xf32> -> vector<8x128xf32>
    %114 = arith.addf %112, %113 : vector<8x128xf32>
    %115 = vector.broadcast %9 : vector<1x128xf32> to vector<8x128xf32>
    %116 = arith.addf %114, %115 : vector<8x128xf32>
    %117 = vector.broadcast %18 : vector<1x128xf32> to vector<8x128xf32>
    %118 = arith.mulf %116, %117 : vector<8x128xf32>
    %119 = math.tanh %118 : vector<8x128xf32>
    %120 = vector.broadcast %18 : vector<1x128xf32> to vector<8x128xf32>
    %121 = arith.mulf %120, %119 : vector<8x128xf32>
    %122 = vector.broadcast %25 : vector<1x128xf32> to vector<8x128xf32>
    %123 = arith.addf %121, %122 : vector<8x128xf32>
    %124 = vector.extract_strided_slice %123 {offsets = [0, 0], sizes = [8, 32], strides = [1, 1]} : vector<8x128xf32> to vector<8x32xf32>
    %125 = vector.extract_strided_slice %123 {offsets = [0, 32], sizes = [8, 32], strides = [1, 1]} : vector<8x128xf32> to vector<8x32xf32>
    %126 = vector.extract_strided_slice %123 {offsets = [0, 64], sizes = [8, 32], strides = [1, 1]} : vector<8x128xf32> to vector<8x32xf32>
    %127 = vector.extract_strided_slice %123 {offsets = [0, 96], sizes = [8, 32], strides = [1, 1]} : vector<8x128xf32> to vector<8x32xf32>
    %128 = arith.mulf %125, %109 : vector<8x32xf32>
    %129 = arith.mulf %124, %126 : vector<8x32xf32>
    %130 = arith.addf %128, %129 : vector<8x32xf32>
    %131 = math.tanh %130 : vector<8x32xf32>
    %132 = arith.mulf %127, %131 : vector<8x32xf32>
    %133 = vector.extract_strided_slice %7 {offsets = [40, 0], sizes = [8, 128], strides = [1, 1]} : vector<64x128xf32> to vector<8x128xf32>
    %cst_22 = arith.constant dense<0.000000e+00> : vector<8x128xf32>
    %134 = tpu.matmul %132, %8, %cst_22 {dimension_numbers = #tpu.dot_dimension_numbers<[1], [0], [0], [1], [0, 0, 1, 1], [], []>} : vector<8x32xf32>, vector<32x128xf32>, vector<8x128xf32> -> vector<8x128xf32>
    %135 = arith.addf %133, %134 : vector<8x128xf32>
    %136 = vector.broadcast %9 : vector<1x128xf32> to vector<8x128xf32>
    %137 = arith.addf %135, %136 : vector<8x128xf32>
    %138 = vector.broadcast %18 : vector<1x128xf32> to vector<8x128xf32>
    %139 = arith.mulf %137, %138 : vector<8x128xf32>
    %140 = math.tanh %139 : vector<8x128xf32>
    %141 = vector.broadcast %18 : vector<1x128xf32> to vector<8x128xf32>
    %142 = arith.mulf %141, %140 : vector<8x128xf32>
    %143 = vector.broadcast %25 : vector<1x128xf32> to vector<8x128xf32>
    %144 = arith.addf %142, %143 : vector<8x128xf32>
    %145 = vector.extract_strided_slice %144 {offsets = [0, 0], sizes = [8, 32], strides = [1, 1]} : vector<8x128xf32> to vector<8x32xf32>
    %146 = vector.extract_strided_slice %144 {offsets = [0, 32], sizes = [8, 32], strides = [1, 1]} : vector<8x128xf32> to vector<8x32xf32>
    %147 = vector.extract_strided_slice %144 {offsets = [0, 64], sizes = [8, 32], strides = [1, 1]} : vector<8x128xf32> to vector<8x32xf32>
    %148 = vector.extract_strided_slice %144 {offsets = [0, 96], sizes = [8, 32], strides = [1, 1]} : vector<8x128xf32> to vector<8x32xf32>
    %149 = arith.mulf %146, %130 : vector<8x32xf32>
    %150 = arith.mulf %145, %147 : vector<8x32xf32>
    %151 = arith.addf %149, %150 : vector<8x32xf32>
    %152 = math.tanh %151 : vector<8x32xf32>
    %153 = arith.mulf %148, %152 : vector<8x32xf32>
    %154 = vector.extract_strided_slice %7 {offsets = [48, 0], sizes = [8, 128], strides = [1, 1]} : vector<64x128xf32> to vector<8x128xf32>
    %cst_23 = arith.constant dense<0.000000e+00> : vector<8x128xf32>
    %155 = tpu.matmul %153, %8, %cst_23 {dimension_numbers = #tpu.dot_dimension_numbers<[1], [0], [0], [1], [0, 0, 1, 1], [], []>} : vector<8x32xf32>, vector<32x128xf32>, vector<8x128xf32> -> vector<8x128xf32>
    %156 = arith.addf %154, %155 : vector<8x128xf32>
    %157 = vector.broadcast %9 : vector<1x128xf32> to vector<8x128xf32>
    %158 = arith.addf %156, %157 : vector<8x128xf32>
    %159 = vector.broadcast %18 : vector<1x128xf32> to vector<8x128xf32>
    %160 = arith.mulf %158, %159 : vector<8x128xf32>
    %161 = math.tanh %160 : vector<8x128xf32>
    %162 = vector.broadcast %18 : vector<1x128xf32> to vector<8x128xf32>
    %163 = arith.mulf %162, %161 : vector<8x128xf32>
    %164 = vector.broadcast %25 : vector<1x128xf32> to vector<8x128xf32>
    %165 = arith.addf %163, %164 : vector<8x128xf32>
    %166 = vector.extract_strided_slice %165 {offsets = [0, 0], sizes = [8, 32], strides = [1, 1]} : vector<8x128xf32> to vector<8x32xf32>
    %167 = vector.extract_strided_slice %165 {offsets = [0, 32], sizes = [8, 32], strides = [1, 1]} : vector<8x128xf32> to vector<8x32xf32>
    %168 = vector.extract_strided_slice %165 {offsets = [0, 64], sizes = [8, 32], strides = [1, 1]} : vector<8x128xf32> to vector<8x32xf32>
    %169 = vector.extract_strided_slice %165 {offsets = [0, 96], sizes = [8, 32], strides = [1, 1]} : vector<8x128xf32> to vector<8x32xf32>
    %170 = arith.mulf %167, %151 : vector<8x32xf32>
    %171 = arith.mulf %166, %168 : vector<8x32xf32>
    %172 = arith.addf %170, %171 : vector<8x32xf32>
    %173 = math.tanh %172 : vector<8x32xf32>
    %174 = arith.mulf %169, %173 : vector<8x32xf32>
    %175 = vector.extract_strided_slice %7 {offsets = [56, 0], sizes = [8, 128], strides = [1, 1]} : vector<64x128xf32> to vector<8x128xf32>
    %cst_24 = arith.constant dense<0.000000e+00> : vector<8x128xf32>
    %176 = tpu.matmul %174, %8, %cst_24 {dimension_numbers = #tpu.dot_dimension_numbers<[1], [0], [0], [1], [0, 0, 1, 1], [], []>} : vector<8x32xf32>, vector<32x128xf32>, vector<8x128xf32> -> vector<8x128xf32>
    %177 = arith.addf %175, %176 : vector<8x128xf32>
    %178 = vector.broadcast %9 : vector<1x128xf32> to vector<8x128xf32>
    %179 = arith.addf %177, %178 : vector<8x128xf32>
    %180 = vector.broadcast %18 : vector<1x128xf32> to vector<8x128xf32>
    %181 = arith.mulf %179, %180 : vector<8x128xf32>
    %182 = math.tanh %181 : vector<8x128xf32>
    %183 = vector.broadcast %18 : vector<1x128xf32> to vector<8x128xf32>
    %184 = arith.mulf %183, %182 : vector<8x128xf32>
    %185 = vector.broadcast %25 : vector<1x128xf32> to vector<8x128xf32>
    %186 = arith.addf %184, %185 : vector<8x128xf32>
    %187 = vector.extract_strided_slice %186 {offsets = [0, 0], sizes = [8, 32], strides = [1, 1]} : vector<8x128xf32> to vector<8x32xf32>
    %188 = vector.extract_strided_slice %186 {offsets = [0, 32], sizes = [8, 32], strides = [1, 1]} : vector<8x128xf32> to vector<8x32xf32>
    %189 = vector.extract_strided_slice %186 {offsets = [0, 64], sizes = [8, 32], strides = [1, 1]} : vector<8x128xf32> to vector<8x32xf32>
    %190 = vector.extract_strided_slice %186 {offsets = [0, 96], sizes = [8, 32], strides = [1, 1]} : vector<8x128xf32> to vector<8x32xf32>
    %191 = arith.mulf %188, %172 : vector<8x32xf32>
    %192 = arith.mulf %187, %189 : vector<8x32xf32>
    %193 = arith.addf %191, %192 : vector<8x32xf32>
    %194 = math.tanh %193 : vector<8x32xf32>
    %195 = arith.mulf %190, %194 : vector<8x32xf32>
    %196 = tpu.concatenate %48, %69, %90, %111, %132, %153, %174, %195 in 1 : vector<8x32xf32>, vector<8x32xf32>, vector<8x32xf32>, vector<8x32xf32>, vector<8x32xf32>, vector<8x32xf32>, vector<8x32xf32>, vector<8x32xf32> -> vector<8x256xf32>
    %c0_25 = arith.constant 0 : index
    %c0_26 = arith.constant 0 : index
    %197 = vector.load %arg4[%c0_25, %c0_26] : memref<256x32xf32, #tpu.memory_space<vmem>>, vector<256x32xf32>
    %cst_27 = arith.constant dense<0.000000e+00> : vector<8x32xf32>
    %198 = tpu.matmul %196, %197, %cst_27 {dimension_numbers = #tpu.dot_dimension_numbers<[1], [0], [0], [1], [0, 0, 1, 1], [], []>} : vector<8x256xf32>, vector<256x32xf32>, vector<8x32xf32> -> vector<8x32xf32>
    %c0_28 = arith.constant 0 : index
    %c0_29 = arith.constant 0 : index
    %199 = vector.load %arg5[%c0_28, %c0_29] : memref<1x32xf32, #tpu.memory_space<vmem>>, vector<1x32xf32>
    %200 = vector.broadcast %199 : vector<1x32xf32> to vector<8x32xf32>
    %201 = arith.addf %198, %200 : vector<8x32xf32>
    %cst_30 = arith.constant 0.000000e+00 : f32
    %202 = vector.broadcast %cst_30 : f32 to vector<8x32xf32>
    %203 = arith.maximumf %201, %202 : vector<8x32xf32>
    %c0_31 = arith.constant 0 : index
    %c0_32 = arith.constant 0 : index
    %204 = vector.load %arg6[%c0_31, %c0_32] : memref<32x32xf32, #tpu.memory_space<vmem>>, vector<32x32xf32>
    %cst_33 = arith.constant dense<0.000000e+00> : vector<8x32xf32>
    %205 = tpu.matmul %203, %204, %cst_33 {dimension_numbers = #tpu.dot_dimension_numbers<[1], [0], [0], [1], [0, 0, 1, 1], [], []>} : vector<8x32xf32>, vector<32x32xf32>, vector<8x32xf32> -> vector<8x32xf32>
    %c0_34 = arith.constant 0 : index
    %c0_35 = arith.constant 0 : index
    %206 = vector.load %arg7[%c0_34, %c0_35] : memref<1x32xf32, #tpu.memory_space<vmem>>, vector<1x32xf32>
    %207 = vector.broadcast %206 : vector<1x32xf32> to vector<8x32xf32>
    %208 = arith.addf %205, %207 : vector<8x32xf32>
    %cst_36 = arith.constant 0.000000e+00 : f32
    %209 = vector.broadcast %cst_36 : f32 to vector<8x32xf32>
    %210 = arith.maximumf %208, %209 : vector<8x32xf32>
    %c0_37 = arith.constant 0 : index
    %c0_38 = arith.constant 0 : index
    %211 = vector.load %arg8[%c0_37, %c0_38] : memref<32x32xf32, #tpu.memory_space<vmem>>, vector<32x32xf32>
    %cst_39 = arith.constant dense<0.000000e+00> : vector<8x32xf32>
    %212 = tpu.matmul %210, %211, %cst_39 {dimension_numbers = #tpu.dot_dimension_numbers<[1], [0], [0], [1], [0, 0, 1, 1], [], []>} : vector<8x32xf32>, vector<32x32xf32>, vector<8x32xf32> -> vector<8x32xf32>
    %c0_40 = arith.constant 0 : index
    %c0_41 = arith.constant 0 : index
    %213 = vector.load %arg9[%c0_40, %c0_41] : memref<1x32xf32, #tpu.memory_space<vmem>>, vector<1x32xf32>
    %214 = vector.broadcast %213 : vector<1x32xf32> to vector<8x32xf32>
    %215 = arith.addf %212, %214 : vector<8x32xf32>
    %cst_42 = arith.constant 0.000000e+00 : f32
    %216 = vector.broadcast %cst_42 : f32 to vector<8x32xf32>
    %217 = arith.maximumf %215, %216 : vector<8x32xf32>
    %c0_43 = arith.constant 0 : index
    %c0_44 = arith.constant 0 : index
    %218 = vector.load %arg10[%c0_43, %c0_44] : memref<32x2xf32, #tpu.memory_space<vmem>>, vector<32x2xf32>
    %cst_45 = arith.constant dense<0.000000e+00> : vector<8x2xf32>
    %219 = tpu.matmul %217, %218, %cst_45 {dimension_numbers = #tpu.dot_dimension_numbers<[1], [0], [0], [1], [0, 0, 1, 1], [], []>} : vector<8x32xf32>, vector<32x2xf32>, vector<8x2xf32> -> vector<8x2xf32>
    %c0_46 = arith.constant 0 : index
    %c0_47 = arith.constant 0 : index
    %220 = vector.load %arg11[%c0_46, %c0_47] : memref<1x2xf32, #tpu.memory_space<vmem>>, vector<1x2xf32>
    %221 = vector.broadcast %220 : vector<1x2xf32> to vector<8x2xf32>
    %222 = arith.addf %219, %221 : vector<8x2xf32>
    %cst_48 = arith.constant 0.000000e+00 : f32
    %223 = vector.broadcast %cst_48 : f32 to vector<8x62xf32>
    %224 = tpu.concatenate %222, %195, %193, %223 in 1 : vector<8x2xf32>, vector<8x32xf32>, vector<8x32xf32>, vector<8x62xf32> -> vector<8x128xf32>
    %c0_49 = arith.constant 0 : index
    %c0_50 = arith.constant 0 : index
    %225 = vector.load %arg12[%c0_49, %c0_50] : memref<8x128xf32, #tpu.memory_space<vmem>>, vector<8x128xf32>
    tpu.vector_store %arg12[%c0_49, %c0_50], %224 {strides = array<i32>} : memref<8x128xf32, #tpu.memory_space<vmem>>, vector<8x128xf32>,
    return
  }
}

</mosaic_0001>

<bundles_post_ra>
// kernel: sentiment_net_forward.1
= control target key start
LH: loop header
LB: loop body
LE: loop exit
PB: predicated region body
PF: predicated region fallthrough
CT: control target
= control target key end

     0   :  { %v1786_v0 = vmov 0   ;;  %v1787_v3 = vmov 0.0   ;;  %vm1788_vm0 = vmmov 0   ;;  %v49_v16 = vlaneseq  ;;  %s1791_s13 = smov 32   ;;  %s1792_s26 = smov 96   ;;  %s2340_s0 = inlined_call_operand.vmem [shape: s32[64,1], index: 0, kind: input, shape index: {}]   ;;  %s2341_s1 = inlined_call_operand.vmem [shape: f32[64,128], index: 1, kind: input, shape index: {}]   ;;  %s2342_s2 = inlined_call_operand.vmem [shape: f32[32,128], index: 2, kind: input, shape index: {}]   ;;  %s2343_s3 = inlined_call_operand.vmem [shape: f32[1,128], index: 3, kind: input, shape index: {}]   ;;  %s2344_s4 = inlined_call_operand.vmem [shape: f32[256,32], index: 4, kind: input, shape index: {}]   ;;  %s2345_s6 = inlined_call_operand.vmem [shape: f32[32,32], index: 6, kind: input, shape index: {}]   ;;  %s2346_s5 = inlined_call_operand.vmem [shape: f32[1,32], index: 5, kind: input, shape index: {}]   ;;  %s2347_s8 = inlined_call_operand.vmem [shape: f32[32,32], index: 8, kind: input, shape index: {}]   ;;  %s2348_s7 = inlined_call_operand.vmem [shape: f32[1,32], index: 7, kind: input, shape index: {}]   ;;  %s2349_s10 = inlined_call_operand.vmem [shape: f32[32,2], index: 10, kind: input, shape index: {}]   ;;  %s2350_s9 = inlined_call_operand.vmem [shape: f32[1,32], index: 9, kind: input, shape index: {}]   ;;  %s2351_s11 = inlined_call_operand.vmem [shape: f32[1,2], index: 11, kind: input, shape index: {}]   ;;  %s2352_s12 = inlined_call_operand.vmem [shape: f32[8,128], index: 12, kind: output, shape index: {}]  }
   0x1   :  { %1742 = vset.pattern.permute.xlu0 %v1786_v0  ;;  %v41_v1 = vld [vmem:[%s2340_s0] sm:$0xff]  ;;  %v106_v2 = vld [vmem:[%s2341_s1 + $0x38] sm:$0xff]  ;;  %1612 = vmatprep.subr.mxu1 %v1787_v3  ;;  %v105_v4 = vld [vmem:[%s2341_s1 + $0x30] sm:$0xff]  ;;  %vm107_vm1 = vcmask 523264   ;;  %v1789_v25 = vmov 1.0   ;;  %vm243_vm4 = vcmask 785408  }
   0x2   :  { %52 = vperm.xlu0 %1742, %v41_v1   ;;  %1584 = vmatprep.subr.mxu0 %v106_v2  ;;  %v42_v5 = vld [vmem:[%s2340_s0 + $0x8] sm:$0xff]  ;;  %v1879_v7 = vld [vmem:[%s2342_s2 + $0x18] sm:$0xff]  ;;  %v1885_v8 = vld [vmem:[%s2342_s2 + $0x10] sm:$0xff]  ;;  %v1933_v17 = vand.u32 127, %v49_v16  ;;  %v330_v24 = vshrl.u32 %v49_v16, 7  ;;  %v242_v26 = vsel %vm107_vm1, 0.5, %v1789_v25 }
   0x3   :  { %1585 = vmatpush3.msra.mxu0 %v106_v2  ;;  %v104_v6 = vld [vmem:[%s2341_s1 + $0x28] sm:$0xff]  ;;  %1743 = vset.pattern.permute.xlu1 %v1786_v0  ;;  %v103_v9 = vld [vmem:[%s2341_s1 + $0x20] sm:$0xff]  ;;  %v102_v11 = vld [vmem:[%s2341_s1 + $0x18] sm:$0xff]  ;;  %v244_v28 = vsel %vm243_vm4, %v242_v26, 0.5  ;;  %v245_v36 = vsel %vm107_vm1, 0.5, %v1787_v3  ;;  %vm247_vm5 = vcmask 261120  }
   0x4   :  { %1586 = vmatprep.subr.mxu0 %v105_v4  ;;  %1613 = vmatpush3.msra.mxu1 %v1879_v7  ;;  %v1894_v10 = vld [vmem:[%s2342_s2 + $0x8] sm:$0xff]  ;;  %v1904_v12 = vld [vmem:[%s2342_s2] sm:$0xff]  ;;  %v101_v13 = vld [vmem:[%s2341_s1 + $0x10] sm:$0xff]  ;;  %v331_v27 = vsub.s32 0, %v330_v24  ;;  %v246_v37 = vsel %vm243_vm4, %v245_v36, 0.5  ;;  %s1793_s27 = smov 2  }
   0x5   :  { %1587 = vmatpush3.msra.mxu0 %v105_v4  ;;  %1614 = vmatprep.subr.mxu1 %v1787_v3  ;;  %v100_v14 = vld [vmem:[%s2341_s1 + $0x8] sm:$0xff]  ;;  %v99_v15 = vld [vmem:[%s2341_s1] sm:$0xff]  ;;  %v43_v61 = vld [vmem:[%s2340_s0 + $0x10] sm:$0xff]  ;;  %s1794_s28 = smov 34   ;;  %vm1436_vm12 = vcmask 15360   ;;  %vm1438_vm13 = vcmask 277504  }
   0x6   :  { %55 = vperm.xlu0 %1742, %v42_v5   ;;  %1588 = vmatprep.subr.mxu0 %v104_v6  ;;  %v1954_v31 = vld [vmem:[%s2343_s3] ss:$0 sm:$0xff]  ;;  %v1956_v32 = vrot.slane %v244_v28, %v331_v27  ;;  %v1963_v38 = vrot.slane %v246_v37, %v331_v27  ;;  %s1790_s3 = smov 64   ;;  %v44_v5 = vld [vmem:[%s2340_s0 + $0x18] sm:$0xff]  ;;  %vm1440_vm14 = vcmask 539648  }
   0x7   :  { %1589 = vmatpush3.msra.mxu0 %v104_v6  ;;  %1615 = vmatpush3.msra.mxu1 %v1885_v8  ;;  %v45_v28 = vld [vmem:[%s2340_s0 + $0x20] sm:$0xff] }
   0x8   :  { %1590 = vmatprep.subr.mxu0 %v103_v9  ;;  %1616 = vmatprep.subr.mxu1 %v1787_v3 }
   0x9   :  { %1591 = vmatpush3.msra.mxu0 %v103_v9  ;;  %1617 = vmatpush3.msra.mxu1 %v1894_v10 }
   0xa   :  { %1592 = vmatprep.subr.mxu0 %v102_v11  ;;  %1618 = vmatprep.subr.mxu1 %v1787_v3 }
   0xb   :  { %1593 = vmatpush3.msra.mxu0 %v102_v11  ;;  %1619 = vmatpush3.msra.mxu1 %v1904_v12 }
   0xc   :  { %1594 = vmatprep.subr.mxu0 %v101_v13  ;;  %1620 = vmatprep.mubr.msk.f32.mxu1 %vm1788_vm0, %v1787_v3 }
   0xd   :  { %1595 = vmatpush3.msra.mxu0 %v101_v13  ;;  %1621 = vmatmul.mubr.f32.vlgmr.msra.gmra.mxu1 %v1787_v3 }
   0xe   :  { %1596 = vmatprep.subr.mxu0 %v100_v14  ;;  %1623 = vmatprep.subr.mxu1 %v1787_v3 }
   0xf   :  { %1597 = vmatpush3.msra.mxu0 %v100_v14  ;;  %1624 = vmatpush3.msra.mxu1 %v1879_v7 }
  0x10   :  { %1598 = vmatprep.subr.mxu0 %v99_v15  ;;  %1625 = vmatprep.subr.mxu1 %v1787_v3 }
  0x11   :  { %1599 = vmatpush3.msra.mxu0 %v99_v15  ;;  %1626 = vmatpush3.msra.mxu1 %v1885_v8 }
  0x12   :  { %1627 = vmatprep.subr.mxu1 %v1787_v3  ;;  %1631 = vmatprep.mubr.msk.f32.mxu1 %vm1788_vm0, %v1787_v3 }
  0x13   :  { %1628 = vmatpush3.msra.mxu1 %v1894_v10  ;;  %1645 = vmatprep.subr.mxu0 %v1787_v3 }
  0x14   :  { %1629 = vmatprep.subr.mxu1 %v1787_v3 }
  0x15   :  { %1630 = vmatpush3.msra.mxu1 %v1904_v12 }
  0x16   :  { %1634 = vmatprep.subr.mxu1 %v1787_v3 }
  0x7d   :  { %v53_v18 = vpop.permute.xlu0 %52 }
  0x7e   :  { %vm75_vm2 = vcmp.eq.s32.totalorder %v53_v18, %v1933_v17 }
  0x7f   :  { %v1447_v19 = vsel %vm75_vm2, 1.0, %v1787_v3 }
  0x80   :  { %1600 = vmatprep.mubr.msk.f32.mxu0 %vm107_vm1, %v1447_v19 }
  0x81   :  { %v56_v20 = vpop.permute.xlu0 %55 }
  0x82   :  { %vm76_vm3 = vcmp.eq.s32.totalorder %v56_v20, %v1933_v17 }
  0x83   :  { %v1448_v21 = vsel %vm76_vm3, 1.0, %v1787_v3 }
  0x84   :  { %1601 = vmatmul.mubr.msk.f32.vlgmr.msra.gmra.mxu0 %vm107_vm1, %v1448_v21 }
  0x85   :  { %1646 = vmatpush3.msra.mxu0 %v1879_v7 }
  0x86   :  { %1647 = vmatprep.subr.mxu0 %v1787_v3 }
  0x87   :  { %1648 = vmatpush3.msra.mxu0 %v1885_v8 }
  0x88   :  { %1649 = vmatprep.subr.mxu0 %v1787_v3 }
  0x89   :  { %1650 = vmatpush3.msra.mxu0 %v1894_v10 }
  0x8a   :  { %1651 = vmatprep.subr.mxu0 %v1787_v3 }
  0x8b   :  { %1652 = vmatpush3.msra.mxu0 %v1904_v12 }
  0x8c   :  { %1667 = vmatprep.subr.mxu0 %v1787_v3 }
  0xcd   :  { %v317_v22 = vpop.f32.mrf.mxu1 }
  0xcf   :  { %v1622_v23 = vpop.f32.mrf.mxu1 }
 0x144   :  { %v1602_v29 = vpop.f32.mrf.mxu0 }
 0x146   :  { %v198_v30 = vpop.f32.mrf.mxu0 }
 0x147   :  { %v321_v33 = vadd.f32 %v317_v22, %v198_v30 }
 0x149   :  { %v328_v34 = vadd.f32 %v1954_v31, %v321_v33 }
 0x14b   :  { %v333_v35 = vmul.f32 %v1956_v32, %v328_v34 }
 0x14d   :  { %1754 = vtanh.f32 %v333_v35 }
 0x15a   :  { %v1755_v39 = vpop.eup %1754 }
 0x15b   :  { %v335_v40 = vmul.f32 %v1755_v39, %v1956_v32  ;;  %v46_v39 = vld [vmem:[%s2340_s0 + $0x28] sm:$0xff] }
 0x15d   :  { %v340_v41 = vadd.f32 %v1963_v38, %v335_v40  ;;  %v48_v40 = vld [vmem:[%s2340_s0 + $0x38] sm:$0xff] }
 0x15f   :  { %343 = vrot.lane.b32.xlu1 %v340_v41, %s1790_s3  ;;  %v341_v44 = vmul.f32 0.0, %v340_v41 }
 0x1d1   :  { %v344_v42 = vpop.permute.xlu1 %343 }
 0x1d2   :  { %v346_v43 = vmul.f32 %v344_v42, %v340_v41 }
 0x1d4   :  { %348 = vrot.lane.b32.xlu1 %v346_v43, %s1791_s13 }
 0x246   :  { %v349_v45 = vpop.permute.xlu1 %348 }
 0x247   :  { %v351_v46 = vadd.f32 %v349_v45, %v341_v44 }
 0x249   :  { %1756 = vtanh.f32 %v351_v46 }
 0x256   :  { %v1757_v47 = vpop.eup %1756 }
 0x257   :  { %354 = vrot.lane.b32.xlu0 %v1757_v47, %s1790_s3 }
 0x2c9   :  { %v355_v48 = vpop.permute.xlu0 %354 }
 0x2ca   :  { %v357_v49 = vmul.f32 %v355_v48, %v340_v41 }
 0x2cc   :  { %359 = vrot.lane.b32.xlu1 %v357_v49, %s1791_s13 }
 0x33e   :  { %v1971_v50 = vpop.permute.xlu1 %359 }
 0x33f   :  { %1632 = vmatmul.mubr.msk.f32.vlgmr.msra.gmra.mxu1 %vm247_vm5, %v1971_v50 }
 0x340   :  { %1635 = vmatpush3.msra.mxu1 %v1879_v7  ;;  %1642 = vmatprep.mubr.msk.f32.mxu1 %vm1788_vm0, %v1787_v3 }
 0x341   :  { %1636 = vmatprep.subr.mxu1 %v1787_v3 }
 0x342   :  { %1637 = vmatpush3.msra.mxu1 %v1885_v8 }
 0x343   :  { %1638 = vmatprep.subr.mxu1 %v1787_v3 }
 0x344   :  { %1639 = vmatpush3.msra.mxu1 %v1894_v10 }
 0x345   :  { %1640 = vmatprep.subr.mxu1 %v1787_v3 }
 0x346   :  { %1641 = vmatpush3.msra.mxu1 %v1904_v12 }
 0x347   :  { %1656 = vmatprep.subr.mxu1 %v1787_v3 }
 0x3ff   :  { %v429_v51 = vpop.f32.mrf.mxu1 }
 0x400   :  { %v433_v52 = vadd.f32 %v1602_v29, %v429_v51  ;;  %v47_v29 = vld [vmem:[%s2340_s0 + $0x30] sm:$0xff] }
 0x401   :  { %v1633_v53 = vpop.f32.mrf.mxu1 }
 0x402   :  { %v434_v54 = vadd.f32 %v1954_v31, %v433_v52 }
 0x404   :  { %v435_v55 = vmul.f32 %v434_v54, %v1956_v32 }
 0x406   :  { %1758 = vtanh.f32 %v435_v55 }
 0x413   :  { %v1759_v56 = vpop.eup %1758 }
 0x414   :  { %v437_v57 = vmul.f32 %v1759_v56, %v1956_v32 }
 0x416   :  { %v438_v58 = vadd.f32 %v437_v57, %v1963_v38 }
 0x418   :  { %441 = vrot.lane.b32.xlu0 %v438_v58, %s1790_s3  ;;  %v439_v62 = vmul.f32 %v438_v58, %v351_v46 }
 0x48a   :  { %v442_v59 = vpop.permute.xlu0 %441 }
 0x48b   :  { %v444_v60 = vmul.f32 %v442_v59, %v438_v58 }
 0x48d   :  { %446 = vrot.lane.b32.xlu1 %v444_v60, %s1791_s13 }
 0x491   :  { %58 = vperm.xlu1 %1743, %v43_v61  }
 0x4ff   :  { %v447_v63 = vpop.permute.xlu1 %446 }
 0x500   :  { %v449_v0 = vadd.f32 %v447_v63, %v439_v62 }
 0x502   :  { %1760 = vtanh.f32 %v449_v0 }
 0x50c   :  { %v59_v1 = vpop.permute.xlu1 %58 }
 0x50d   :  { %vm77_vm6 = vcmp.eq.s32.totalorder %v59_v1, %v1933_v17 }
 0x50e   :  { %v1449_v2 = vsel %vm77_vm6, 1.0, %v1787_v3 }
 0x50f   :  { %v1761_v4 = vpop.eup %1760  ;;  %1603 = vmatprep.mubr.msk.f32.mxu0 %vm107_vm1, %v1449_v2 }
 0x510   :  { %452 = vrot.lane.b32.xlu0 %v1761_v4, %s1790_s3 }
 0x514   :  { %61 = vperm.xlu0 %1742, %v44_v5  }
 0x582   :  { %v453_v6 = vpop.permute.xlu0 %452 }
 0x583   :  { %v2001_v9 = vmul.f32 %v453_v6, %v438_v58 }
 0x585   :  { %457 = vrot.lane.b32.xlu1 %v2001_v9, %s1791_s13 }
 0x58f   :  { %v62_v11 = vpop.permute.xlu0 %61 }
 0x590   :  { %vm78_vm7 = vcmp.eq.s32.totalorder %v62_v11, %v1933_v17 }
 0x591   :  { %v1450_v13 = vsel %vm78_vm7, 1.0, %v1787_v3 }
 0x592   :  { %1604 = vmatmul.mubr.msk.f32.gmra.mxu0 %vm107_vm1, %v1450_v13 }
 0x5f7   :  { %v458_v14 = vpop.permute.xlu1 %457 }
 0x5f8   :  { %1643 = vmatmul.mubr.msk.f32.vlgmr.msra.gmra.mxu1 %vm247_vm5, %v458_v14 }
 0x5f9   :  { %1657 = vmatpush3.msra.mxu1 %v1879_v7  ;;  %1664 = vmatprep.mubr.msk.f32.mxu1 %vm1788_vm0, %v1787_v3 }
 0x5fa   :  { %1658 = vmatprep.subr.mxu1 %v1787_v3 }
 0x5fb   :  { %1659 = vmatpush3.msra.mxu1 %v1885_v8 }
 0x5fc   :  { %1660 = vmatprep.subr.mxu1 %v1787_v3 }
 0x5fd   :  { %1661 = vmatpush3.msra.mxu1 %v1894_v10 }
 0x5fe   :  { %1662 = vmatprep.subr.mxu1 %v1787_v3 }
 0x5ff   :  { %1663 = vmatpush3.msra.mxu1 %v1904_v12 }
 0x600   :  { %1678 = vmatprep.subr.mxu1 %v1787_v3 }
 0x652   :  { %v2019_v15 = vpop.f32.mrf.mxu0 }
 0x654   :  { %v208_v16 = vpop.f32.mrf.mxu0 }
 0x6b8   :  { %v527_v18 = vpop.f32.mrf.mxu1 }
 0x6b9   :  { %v531_v19 = vadd.f32 %v527_v18, %v208_v16 }
 0x6ba   :  { %v1644_v20 = vpop.f32.mrf.mxu1 }
 0x6bb   :  { %v532_v21 = vadd.f32 %v1954_v31, %v531_v19 }
 0x6bd   :  { %v533_v22 = vmul.f32 %v532_v21, %v1956_v32 }
 0x6bf   :  { %1762 = vtanh.f32 %v533_v22 }
 0x6cc   :  { %v1763_v23 = vpop.eup %1762 }
 0x6cd   :  { %v535_v24 = vmul.f32 %v1763_v23, %v1956_v32 }
 0x6cf   :  { %v536_v25 = vadd.f32 %v535_v24, %v1963_v38 }
 0x6d1   :  { %539 = vrot.lane.b32.xlu0 %v536_v25, %s1790_s3  ;;  %v537_v30 = vmul.f32 %v536_v25, %v449_v0 }
 0x743   :  { %v540_v26 = vpop.permute.xlu0 %539 }
 0x744   :  { %v542_v27 = vmul.f32 %v540_v26, %v536_v25 }
 0x746   :  { %544 = vrot.lane.b32.xlu1 %v542_v27, %s1791_s13 }
 0x74a   :  { %64 = vperm.xlu1 %1743, %v45_v28  }
 0x74e   :  { %70 = vperm.xlu1 %1743, %v47_v29  }
 0x7b8   :  { %v545_v33 = vpop.permute.xlu1 %544 }
 0x7b9   :  { %v547_v34 = vadd.f32 %v545_v33, %v537_v30 }
 0x7bb   :  { %1764 = vtanh.f32 %v547_v34 }
 0x7c5   :  { %v65_v35 = vpop.permute.xlu1 %64 }
 0x7c6   :  { %vm79_vm8 = vcmp.eq.s32.totalorder %v65_v35, %v1933_v17 }
 0x7c7   :  { %v1451_v36 = vsel %vm79_vm8, 1.0, %v1787_v3 }
 0x7c8   :  { %v1765_v37 = vpop.eup %1764  ;;  %1606 = vmatprep.mubr.msk.f32.mxu0 %vm107_vm1, %v1451_v36 }
 0x7c9   :  { %550 = vrot.lane.b32.xlu0 %v1765_v37, %s1790_s3  ;;  %v71_v43 = vpop.permute.xlu1 %70 }
 0x7ca   :  { %vm81_vm9 = vcmp.eq.s32.totalorder %v71_v43, %v1933_v17 }
 0x7cb   :  { %v1453_v46 = vsel %vm81_vm9, 1.0, %v1787_v3 }
 0x7cd   :  { %67 = vperm.xlu0 %1742, %v46_v39  }
 0x7d1   :  { %73 = vperm.xlu0 %1742, %v48_v40  }
 0x83b   :  { %v551_v41 = vpop.permute.xlu0 %550 }
 0x83c   :  { %v2043_v42 = vmul.f32 %v551_v41, %v536_v25 }
 0x83e   :  { %555 = vrot.lane.b32.xlu1 %v2043_v42, %s1791_s13 }
 0x848   :  { %v68_v44 = vpop.permute.xlu0 %67 }
 0x849   :  { %vm80_vm10 = vcmp.eq.s32.totalorder %v68_v44, %v1933_v17 }
 0x84a   :  { %v1452_v45 = vsel %vm80_vm10, 1.0, %v1787_v3 }
 0x84b   :  { %1607 = vmatmul.mubr.msk.f32.gmra.mxu0 %vm107_vm1, %v1452_v45 }
 0x84c   :  { %1609 = vmatprep.mubr.msk.f32.mxu0 %vm107_vm1, %v1453_v46  ;;  %v74_v47 = vpop.permute.xlu0 %73 }
 0x84d   :  { %vm82_vm11 = vcmp.eq.s32.totalorder %v74_v47, %v1933_v17 }
 0x84e   :  { %v1454_v48 = vsel %vm82_vm11, 1.0, %v1787_v3 }
 0x84f   :  { %1610 = vmatmul.mubr.msk.f32.gmra.mxu0 %vm107_vm1, %v1454_v48 }
 0x850   :  { %1653 = vmatprep.mubr.msk.f32.mxu0 %vm1788_vm0, %v1787_v3 }
 0x8b0   :  { %v556_v49 = vpop.permute.xlu1 %555 }
 0x8b1   :  { %1654 = vmatmul.mubr.msk.f32.vlgmr.msra.gmra.mxu0 %vm247_vm5, %v556_v49 }
 0x8b2   :  { %1668 = vmatpush3.msra.mxu0 %v1879_v7  ;;  %1675 = vmatprep.mubr.msk.f32.mxu0 %vm1788_vm0, %v1787_v3 }
 0x8b3   :  { %1669 = vmatprep.subr.mxu0 %v1787_v3 }
 0x8b4   :  { %1670 = vmatpush3.msra.mxu0 %v1885_v8 }
 0x8b5   :  { %1671 = vmatprep.subr.mxu0 %v1787_v3 }
 0x8b6   :  { %1672 = vmatpush3.msra.mxu0 %v1894_v10 }
 0x8b7   :  { %1673 = vmatprep.subr.mxu0 %v1787_v3 }
 0x8b8   :  { %1674 = vmatpush3.msra.mxu0 %v1904_v12 }
 0x8b9   :  { %1689 = vmatprep.subr.mxu0 %v1787_v3 }
 0x90b   :  { %v2069_v17 = vpop.f32.mrf.mxu0 }
 0x90d   :  { %v218_v51 = vpop.f32.mrf.mxu0 }
 0x90f   :  { %v2071_v52 = vpop.f32.mrf.mxu0 }
 0x911   :  { %v2073_v53 = vpop.f32.mrf.mxu0 }
 0x971   :  { %v625_v54 = vpop.f32.mrf.mxu0 }
 0x972   :  { %v629_v55 = vadd.f32 %v2019_v15, %v625_v54 }
 0x973   :  { %v1655_v56 = vpop.f32.mrf.mxu0 }
 0x974   :  { %v630_v57 = vadd.f32 %v1954_v31, %v629_v55 }
 0x976   :  { %v631_v58 = vmul.f32 %v630_v57, %v1956_v32 }
 0x978   :  { %1766 = vtanh.f32 %v631_v58 }
 0x985   :  { %v1767_v59 = vpop.eup %1766 }
 0x986   :  { %v633_v60 = vmul.f32 %v1767_v59, %v1956_v32 }
 0x988   :  { %v634_v61 = vadd.f32 %v633_v60, %v1963_v38 }
 0x98a   :  { %637 = vrot.lane.b32.xlu0 %v634_v61, %s1790_s3  ;;  %v635_v0 = vmul.f32 %v634_v61, %v547_v34 }
 0x9fc   :  { %v638_v62 = vpop.permute.xlu0 %637 }
 0x9fd   :  { %v640_v63 = vmul.f32 %v638_v62, %v634_v61 }
 0x9ff   :  { %642 = vrot.lane.b32.xlu1 %v640_v63, %s1791_s13 }
 0xa71   :  { %v643_v1 = vpop.permute.xlu1 %642 }
 0xa72   :  { %v645_v2 = vadd.f32 %v643_v1, %v635_v0 }
 0xa74   :  { %1768 = vtanh.f32 %v645_v2 }
 0xa81   :  { %v1769_v4 = vpop.eup %1768 }
 0xa82   :  { %648 = vrot.lane.b32.xlu0 %v1769_v4, %s1790_s3 }
 0xaf4   :  { %v649_v5 = vpop.permute.xlu0 %648 }
 0xaf5   :  { %v2083_v6 = vmul.f32 %v649_v5, %v634_v61 }
 0xaf7   :  { %653 = vrot.lane.b32.xlu1 %v2083_v6, %s1791_s13 }
 0xb69   :  { %v654_v11 = vpop.permute.xlu1 %653 }
 0xb6a   :  { %1665 = vmatmul.mubr.msk.f32.vlgmr.msra.gmra.mxu1 %vm247_vm5, %v654_v11 }
 0xb6b   :  { %1679 = vmatpush3.msra.mxu1 %v1879_v7  ;;  %1686 = vmatprep.mubr.msk.f32.mxu1 %vm1788_vm0, %v1787_v3 }
 0xb6c   :  { %1680 = vmatprep.subr.mxu1 %v1787_v3 }
 0xb6d   :  { %1681 = vmatpush3.msra.mxu1 %v1885_v8 }
 0xb6e   :  { %1682 = vmatprep.subr.mxu1 %v1787_v3 }
 0xb6f   :  { %1683 = vmatpush3.msra.mxu1 %v1894_v10 }
 0xb70   :  { %1684 = vmatprep.subr.mxu1 %v1787_v3 }
 0xb71   :  { %1685 = vmatpush3.msra.mxu1 %v1904_v12 }
 0xc2a   :  { %v723_v13 = vpop.f32.mrf.mxu1 }
 0xc2b   :  { %v727_v14 = vadd.f32 %v723_v13, %v218_v51 }
 0xc2c   :  { %v1666_v15 = vpop.f32.mrf.mxu1 }
 0xc2d   :  { %v728_v16 = vadd.f32 %v1954_v31, %v727_v14 }
 0xc2f   :  { %v729_v18 = vmul.f32 %v728_v16, %v1956_v32 }
 0xc31   :  { %1770 = vtanh.f32 %v729_v18 }
 0xc3e   :  { %v1771_v19 = vpop.eup %1770 }
 0xc3f   :  { %v731_v20 = vmul.f32 %v1771_v19, %v1956_v32 }
 0xc41   :  { %v732_v21 = vadd.f32 %v731_v20, %v1963_v38  ;;  %v1078_v20 = vld [vmem:[%s2344_s4 + $0x70] sm:$0xff] }
 0xc43   :  { %735 = vrot.lane.b32.xlu0 %v732_v21, %s1790_s3  ;;  %v733_v24 = vmul.f32 %v732_v21, %v645_v2 }
 0xcb5   :  { %v736_v22 = vpop.permute.xlu0 %735 }
 0xcb6   :  { %v738_v23 = vmul.f32 %v736_v22, %v732_v21  ;;  %v1092_v22 = vld [vmem:[%s2344_s4 + $0xe0] sm:$0xff] }
 0xcb8   :  { %740 = vrot.lane.b32.xlu1 %v738_v23, %s1791_s13  ;;  %v1076_v23 = vld [vmem:[%s2344_s4 + $0x60] sm:$0xff] }
 0xd2a   :  { %v741_v25 = vpop.permute.xlu1 %740 }
 0xd2b   :  { %v743_v26 = vadd.f32 %v741_v25, %v733_v24  ;;  %v1091_v24 = vld [vmem:[%s2344_s4 + $0xd8] sm:$0xff] }
 0xd2c   :  { %v1075_v25 = vld [vmem:[%s2344_s4 + $0x58] sm:$0xff] }
 0xd2d   :  { %1772 = vtanh.f32 %v743_v26 }
 0xd3a   :  { %v1773_v27 = vpop.eup %1772 }
 0xd3b   :  { %746 = vrot.lane.b32.xlu0 %v1773_v27, %s1790_s3  ;;  %v1074_v27 = vld [vmem:[%s2344_s4 + $0x50] sm:$0xff] }
 0xdad   :  { %v747_v28 = vpop.permute.xlu0 %746 }
 0xdae   :  { %v749_v29 = vmul.f32 %v747_v28, %v732_v21  ;;  %v1077_v21 = vld [vmem:[%s2344_s4 + $0x68] sm:$0xff] }
 0xdaf   :  { %v1089_v28 = vld [vmem:[%s2344_s4 + $0xc8] sm:$0xff] }
 0xdb0   :  { %751 = vrot.lane.b32.xlu1 %v749_v29, %s1791_s13  ;;  %v1073_v29 = vld [vmem:[%s2344_s4 + $0x48] sm:$0xff] }
 0xe22   :  { %v2105_v30 = vpop.permute.xlu1 %751 }
 0xe23   :  { %1676 = vmatmul.mubr.msk.f32.vlgmr.msra.gmra.mxu0 %vm247_vm5, %v2105_v30 }
 0xe24   :  { %1690 = vmatpush3.msra.mxu0 %v1879_v7  ;;  %1697 = vmatprep.mubr.msk.f32.mxu0 %vm1788_vm0, %v1787_v3 }
 0xe25   :  { %1691 = vmatprep.subr.mxu0 %v1787_v3 }
 0xe26   :  { %1692 = vmatpush3.msra.mxu0 %v1885_v8 }
 0xe27   :  { %1693 = vmatprep.subr.mxu0 %v1787_v3 }
 0xe28   :  { %1694 = vmatpush3.msra.mxu0 %v1894_v10 }
 0xe29   :  { %1695 = vmatprep.subr.mxu0 %v1787_v3 }
 0xe2a   :  { %1696 = vmatpush3.msra.mxu0 %v1904_v12 }
 0xe2b   :  { %1700 = vmatprep.subr.mxu0 %v1787_v3 }
 0xee3   :  { %v821_v33 = vpop.f32.mrf.mxu0 }
 0xee4   :  { %v825_v7 = vadd.f32 %v2069_v17, %v821_v33  ;;  %v1088_v33 = vld [vmem:[%s2344_s4 + $0xc0] sm:$0xff] }
 0xee5   :  { %v1677_v34 = vpop.f32.mrf.mxu0 }
 0xee6   :  { %v826_v35 = vadd.f32 %v1954_v31, %v825_v7  ;;  %v1072_v7 = vld [vmem:[%s2344_s4 + $0x40] sm:$0xff]  ;;  %v1087_v34 = vld [vmem:[%s2344_s4 + $0xb8] sm:$0xff] }
 0xee8   :  { %v827_v36 = vmul.f32 %v826_v35, %v1956_v32  ;;  %v1071_v35 = vld [vmem:[%s2344_s4 + $0x38] sm:$0xff] }
 0xeea   :  { %1774 = vtanh.f32 %v827_v36  ;;  %v1086_v36 = vld [vmem:[%s2344_s4 + $0xb0] sm:$0xff] }
 0xef7   :  { %v1775_v8 = vpop.eup %1774 }
 0xef8   :  { %v829_v37 = vmul.f32 %v1775_v8, %v1956_v32  ;;  %v1070_v8 = vld [vmem:[%s2344_s4 + $0x30] sm:$0xff] }
 0xefa   :  { %v830_v10 = vadd.f32 %v829_v37, %v1963_v38  ;;  %v1085_v37 = vld [vmem:[%s2344_s4 + $0xa8] sm:$0xff] }
 0xefc   :  { %833 = vrot.lane.b32.xlu0 %v830_v10, %s1790_s3  ;;  %v831_v40 = vmul.f32 %v830_v10, %v743_v26  ;;  %v1090_v26 = vld [vmem:[%s2344_s4 + $0xd0] sm:$0xff] }
 0xf6e   :  { %v834_v39 = vpop.permute.xlu0 %833 }
 0xf6f   :  { %v836_v12 = vmul.f32 %v834_v39, %v830_v10  ;;  %v1084_v39 = vld [vmem:[%s2344_s4 + $0xa0] sm:$0xff] }
 0xf71   :  { %838 = vrot.lane.b32.xlu1 %v836_v12, %s1791_s13 }
 0xfe3   :  { %v839_v41 = vpop.permute.xlu1 %838 }
 0xfe4   :  { %v841_v43 = vadd.f32 %v839_v41, %v831_v40 }
 0xfe6   :  { %1776 = vtanh.f32 %v841_v43 }
 0xff3   :  { %v1777_v44 = vpop.eup %1776 }
 0xff4   :  { %844 = vrot.lane.b32.xlu0 %v1777_v44, %s1790_s3  ;;  %v1083_v44 = vld [vmem:[%s2344_s4 + $0x98] sm:$0xff] }
0x1066   :  { %v845_v45 = vpop.permute.xlu0 %844 }
0x1067   :  { %v847_v46 = vmul.f32 %v845_v45, %v830_v10  ;;  %v1069_v10 = vld [vmem:[%s2344_s4 + $0x28] sm:$0xff]  ;;  %v1067_v45 = vld [vmem:[%s2344_s4 + $0x18] sm:$0xff] }
0x1069   :  { %849 = vrot.lane.b32.xlu1 %v847_v46, %s1791_s13 }
0x10db   :  { %v850_v47 = vpop.permute.xlu1 %849 }
0x10dc   :  { %1687 = vmatmul.mubr.msk.f32.vlgmr.msra.gmra.mxu1 %vm247_vm5, %v850_v47  ;;  %v1066_v47 = vld [vmem:[%s2344_s4 + $0x10] sm:$0xff] }
0x119c   :  { %v919_v48 = vpop.f32.mrf.mxu1 }
0x119d   :  { %v923_v49 = vadd.f32 %v919_v48, %v2073_v53  ;;  %v1081_v48 = vld [vmem:[%s2344_s4 + $0x88] sm:$0xff] }
0x119e   :  { %v1688_v17 = vpop.f32.mrf.mxu1 }
0x119f   :  { %v924_v51 = vadd.f32 %v1954_v31, %v923_v49  ;;  %v1065_v49 = vld [vmem:[%s2344_s4 + $0x8] sm:$0xff]  ;;  %v1080_v17 = vld [vmem:[%s2344_s4 + $0x80] sm:$0xff] }
0x11a1   :  { %v925_v54 = vmul.f32 %v924_v51, %v1956_v32  ;;  %v1064_v51 = vld [vmem:[%s2344_s4] sm:$0xff] }
0x11a3   :  { %1778 = vtanh.f32 %v925_v54 }
0x11b0   :  { %v1779_v55 = vpop.eup %1778 }
0x11b1   :  { %v927_v56 = vmul.f32 %v1779_v55, %v1956_v32 }
0x11b3   :  { %v928_v57 = vadd.f32 %v927_v56, %v1963_v38 }
0x11b5   :  { %931 = vrot.lane.b32.xlu0 %v928_v57, %s1790_s3  ;;  %v929_v60 = vmul.f32 %v928_v57, %v841_v43  ;;  %v1068_v43 = vld [vmem:[%s2344_s4 + $0x20] sm:$0xff] }
0x1227   :  { %v932_v58 = vpop.permute.xlu0 %931 }
0x1228   :  { %v934_v59 = vmul.f32 %v932_v58, %v928_v57 }
0x122a   :  { %936 = vrot.lane.b32.xlu1 %v934_v59, %s1791_s13 }
0x129c   :  { %v937_v61 = vpop.permute.xlu1 %936 }
0x129d   :  { %v2136_v53 = vadd.f32 %v937_v61, %v929_v60 }
0x129f   :  { %1780 = vtanh.f32 %v2136_v53 }
0x12ac   :  { %v1781_v62 = vpop.eup %1780 }
0x12ad   :  { %942 = vrot.lane.b32.xlu0 %v1781_v62, %s1790_s3 }
0x131f   :  { %v943_v63 = vpop.permute.xlu0 %942 }
0x1320   :  { %v2140_v0 = vmul.f32 %v943_v63, %v928_v57 }
0x1322   :  { %947 = vrot.lane.b32.xlu1 %v2140_v0, %s1791_s13  ;;  %v1749_v55 = vpack.i.bf16 %v2043_v42, %v2140_v0 }
0x1394   :  { %v948_v1 = vpop.permute.xlu1 %947 }
0x1395   :  { %1698 = vmatmul.mubr.msk.f32.vlgmr.msra.gmra.mxu0 %vm247_vm5, %v948_v1 }
0x1396   :  { %1708 = vmatprep.mubr.msk.f32.mxu0 %vm1788_vm0, %v1787_v3 }
0x1455   :  { %v1017_v2 = vpop.f32.mrf.mxu0 }
0x1456   :  { %v1021_v4 = vadd.f32 %v2071_v52, %v1017_v2  ;;  %v1744_v52 = vpack.i.bf16 %v2001_v9, %v847_v46  ;;  %v1093_v9 = vld [vmem:[%s2344_s4 + $0xe8] sm:$0xff]  ;;  %v1082_v46 = vld [vmem:[%s2344_s4 + $0x90] sm:$0xff] }
0x1457   :  { %v1699_v5 = vpop.f32.mrf.mxu0 }
0x1458   :  { %v1022_v11 = vadd.f32 %v1954_v31, %v1021_v4  ;;  %v1095_v31 = vld [vmem:[%s2344_s4 + $0xf8] sm:$0xff] }
0x1459   :  { %1534 = vmatprep.subr.mxu1 %v1095_v31  ;;  %v1177_v5 = vld [vmem:[%s2345_s6 + $0x18] sm:$0xff]  ;;  %v1260_v31 = vld [vmem:[%s2347_s8 + $0x8] sm:$0xff] }
0x145a   :  { %v1023_v13 = vmul.f32 %v1022_v11, %v1956_v32  ;;  %1701 = vmatpush3.msra.mxu0 %v1177_v5 }
0x145b   :  { %1702 = vmatprep.subr.mxu0 %v1787_v3 }
0x145c   :  { %1782 = vtanh.f32 %v1023_v13  ;;  %v1471_v13 = vld [vmem:[%s2346_s5] ss:$0 sm:$0xff] }
0x1469   :  { %v1783_v14 = vpop.eup %1782 }
0x146a   :  { %v1025_v15 = vmul.f32 %v1783_v14, %v1956_v32  ;;  %v1079_v32 = vld [vmem:[%s2344_s4 + $0x78] sm:$0xff] }
0x146b   :  { %1535 = vmatpush3.msra.mxu1 %v1079_v32  ;;  %v1259_v32 = vld [vmem:[%s2347_s8] sm:$0xff] }
0x146c   :  { %v2152_v16 = vadd.f32 %v1025_v15, %v1963_v38  ;;  %v1094_v38 = vld [vmem:[%s2344_s4 + $0xf0] sm:$0xff] }
0x146d   :  { %1536 = vmatprep.subr.mxu1 %v1094_v38  ;;  %v1472_v38 = vld [vmem:[%s2348_s7] ss:$0 sm:$0xff] }
0x146e   :  { %1029 = vrot.lane.b32.xlu0 %v2152_v16, %s1790_s3  ;;  %1537 = vmatpush3.msra.mxu1 %v1078_v20  ;;  %v1027_v12 = vmul.f32 %v2152_v16, %v2136_v53 }
0x146f   :  { %1538 = vmatprep.subr.mxu1 %v1093_v9 }
0x1470   :  { %1539 = vmatpush3.msra.mxu1 %v1077_v21 }
0x1471   :  { %1540 = vmatprep.subr.mxu1 %v1092_v22 }
0x1472   :  { %1541 = vmatpush3.msra.mxu1 %v1076_v23  ;;  %v1347_v23 = vld [vmem:[%s2349_s10 + $0x18] sm:$0xff] }
0x1473   :  { %1542 = vmatprep.subr.mxu1 %v1091_v24  ;;  %v1346_v24 = vld [vmem:[%s2349_s10 + $0x10] sm:$0xff] }
0x1474   :  { %1543 = vmatpush3.msra.mxu1 %v1075_v25  ;;  %v1345_v25 = vld [vmem:[%s2349_s10 + $0x8] sm:$0xff] }
0x1475   :  { %1544 = vmatprep.subr.mxu1 %v1090_v26  ;;  %v1344_v26 = vld [vmem:[%s2349_s10] sm:$0xff] }
0x1476   :  { %1545 = vmatpush3.msra.mxu1 %v1074_v27  ;;  %v1474_v27 = vld [vmem:[%s2350_s9] ss:$0 sm:$0xff] }
0x1477   :  { %1546 = vmatprep.subr.mxu1 %v1089_v28 }
0x1478   :  { %1547 = vmatpush3.msra.mxu1 %v1073_v29 }
0x1479   :  { %1548 = vmatprep.subr.mxu1 %v1088_v33 }
0x147a   :  { %1549 = vmatpush3.msra.mxu1 %v1072_v7 }
0x147b   :  { %1550 = vmatprep.subr.mxu1 %v1087_v34  ;;  %v1476_v34 = vld [vmem:[%s2351_s11] ss:$0 sm:$0xff] }
0x147c   :  { %1551 = vmatpush3.msra.mxu1 %v1071_v35 }
0x147d   :  { %1552 = vmatprep.subr.mxu1 %v1086_v36 }
0x147e   :  { %1553 = vmatpush3.msra.mxu1 %v1070_v8 }
0x147f   :  { %1554 = vmatprep.subr.mxu1 %v1085_v37 }
0x1480   :  { %1555 = vmatpush3.msra.mxu1 %v1069_v10 }
0x1481   :  { %1556 = vmatprep.subr.mxu1 %v1084_v39 }
0x1482   :  { %1557 = vmatpush3.msra.mxu1 %v1068_v43 }
0x1483   :  { %1558 = vmatprep.subr.mxu1 %v1083_v44 }
0x1484   :  { %1559 = vmatpush3.msra.mxu1 %v1067_v45 }
0x1485   :  { %1560 = vmatprep.subr.mxu1 %v1082_v46 }
0x1486   :  { %1561 = vmatpush3.msra.mxu1 %v1066_v47 }
0x1487   :  { %1562 = vmatprep.subr.mxu1 %v1081_v48 }
0x1488   :  { %1563 = vmatpush3.msra.mxu1 %v1065_v49 }
0x1489   :  { %1564 = vmatprep.subr.mxu1 %v1080_v17 }
0x148a   :  { %1565 = vmatpush3.msra.mxu1 %v1064_v51 }
0x14e0   :  { %v1030_v18 = vpop.permute.xlu0 %1029 }
0x14e1   :  { %v1032_v19 = vmul.f32 %v1030_v18, %v2152_v16 }
0x14e3   :  { %1034 = vrot.lane.b32.xlu1 %v1032_v19, %s1791_s13  ;;  %v1262_v19 = vld [vmem:[%s2347_s8 + $0x18] sm:$0xff] }
0x14e7   :  { %1745 = vrot.lane.b32.xlu1 %v1744_v52, %s1790_s3  ;;  %v1261_v52 = vld [vmem:[%s2347_s8 + $0x10] sm:$0xff] }
0x1555   :  { %v1035_v40 = vpop.permute.xlu1 %1034 }
0x1556   :  { %v1037_v41 = vadd.f32 %v1035_v40, %v1027_v12 }
0x1558   :  { %1784 = vtanh.f32 %v1037_v41 }
0x1559   :  { %v1746_v56 = vpop.permute.xlu1 %1745 }
0x155a   :  { %v1748_v59 = vunpack.i.h.bf16 %v1746_v56  ;;  %v1747_v60 = vunpack.i.l.bf16 %v1746_v56 }
0x155c   :  { %v1058_v63 = vsel %vm247_vm5, %v1971_v50, %v1748_v59  ;;  %v1061_v42 = vsel %vm247_vm5, %v2105_v30, %v1747_v60  ;;  %v1176_v50 = vld [vmem:[%s2345_s6 + $0x10] sm:$0xff]  ;;  %v1174_v30 = vld [vmem:[%s2345_s6] sm:$0xff] }
0x155d   :  { %1703 = vmatpush3.msra.mxu0 %v1176_v50 }
0x155e   :  { %1704 = vmatprep.subr.mxu0 %v1787_v3 }
0x1565   :  { %v1785_v54 = vpop.eup %1784 }
0x1566   :  { %1040 = vrot.lane.b32.xlu0 %v1785_v54, %s1790_s3 }
0x156a   :  { %1750 = vrot.lane.b32.xlu0 %v1749_v55, %s1792_s26 }
0x156e   :  { %1433 = vrot.lane.b32.xlu0 %v1037_v41, %s1793_s27 }
0x15d8   :  { %v1041_v57 = vpop.permute.xlu0 %1040 }
0x15d9   :  { %v1043_v58 = vmul.f32 %v1041_v57, %v2152_v16 }
0x15db   :  { %1429 = vrot.lane.b32.xlu1 %v1043_v58, %s1794_s28 }
0x15dc   :  { %v1751_v61 = vpop.permute.xlu0 %1750 }
0x15dd   :  { %v1753_v53 = vunpack.i.h.bf16 %v1751_v61  ;;  %v1752_v62 = vunpack.i.l.bf16 %v1751_v61 }
0x15df   :  { %v1062_v0 = vsel %vm107_vm1, %v1061_v42, %v1752_v62  ;;  %v1059_v1 = vsel %vm107_vm1, %v1058_v63, %v1753_v53 }
0x15e0   :  { %v1063_v2 = vsel %vm243_vm4, %v1062_v0, %v1043_v58  ;;  %v1060_v4 = vsel %vm243_vm4, %v1059_v1, %v2083_v6  ;;  %v1175_v6 = vld [vmem:[%s2345_s6 + $0x8] sm:$0xff]  ;;  %v1434_v37 = vpop.permute.xlu0 %1433 }
0x15e1   :  { %1167 = vmatprep.mubr.f32.mxu1 %v1063_v2  ;;  %1705 = vmatpush3.msra.mxu0 %v1175_v6 }
0x15e2   :  { %1168 = vmatmul.mubr.f32.vlgmr.msra.gmra.mxu1 %v1060_v4  ;;  %1706 = vmatprep.subr.mxu0 %v1787_v3 }
0x15e3   :  { %1707 = vmatpush3.msra.mxu0 %v1174_v30 }
0x15e4   :  { %1711 = vmatprep.subr.mxu0 %v1787_v3 }
0x164d   :  { %v1430_v36 = vpop.permute.xlu1 %1429 }
0x16a2   :  { %v1566_v11 = vpop.f32.mrf.mxu1 }
0x16a4   :  { %v1567_v14 = vpop.f32.mrf.mxu1 }
0x16a5   :  { %v1568_v15 = vadd.f32 %v1567_v14, %v1566_v11 }
0x16a7   :  { %v1170_v16 = vadd.f32 %v1568_v15, %v1471_v13 }
0x16a9   :  { %v1173_v18 = vmax.f32 %v1170_v16, 0.0 }
0x16ab   :  { %1709 = vmatmul.mubr.msk.f32.vlgmr.msra.gmra.mxu0 %vm247_vm5, %v1173_v18 }
0x16ac   :  { %1712 = vmatpush3.msra.mxu0 %v1262_v19  ;;  %1719 = vmatprep.mubr.msk.f32.mxu0 %vm1788_vm0, %v1787_v3 }
0x16ad   :  { %1713 = vmatprep.subr.mxu0 %v1787_v3 }
0x16ae   :  { %1714 = vmatpush3.msra.mxu0 %v1261_v52 }
0x16af   :  { %1715 = vmatprep.subr.mxu0 %v1787_v3 }
0x16b0   :  { %1716 = vmatpush3.msra.mxu0 %v1260_v31 }
0x16b1   :  { %1717 = vmatprep.subr.mxu0 %v1787_v3 }
0x16b2   :  { %1718 = vmatpush3.msra.mxu0 %v1259_v32 }
0x16b3   :  { %1722 = vmatprep.subr.mxu0 %v1787_v3 }
0x176b   :  { %v1254_v20 = vpop.f32.mrf.mxu0 }
0x176c   :  { %v1255_v9 = vadd.f32 %v1472_v38, %v1254_v20 }
0x176d   :  { %v1710_v21 = vpop.f32.mrf.mxu0 }
0x176e   :  { %v1258_v22 = vmax.f32 %v1255_v9, 0.0 }
0x1770   :  { %1720 = vmatmul.mubr.msk.f32.vlgmr.msra.gmra.mxu0 %vm247_vm5, %v1258_v22 }
0x1771   :  { %1723 = vmatpush3.msra.mxu0 %v1347_v23  ;;  %1730 = vmatprep.mubr.msk.f32.mxu0 %vm1788_vm0, %v1787_v3 }
0x1772   :  { %1724 = vmatprep.subr.mxu0 %v1787_v3 }
0x1773   :  { %1725 = vmatpush3.msra.mxu0 %v1346_v24 }
0x1774   :  { %1726 = vmatprep.subr.mxu0 %v1787_v3 }
0x1775   :  { %1727 = vmatpush3.msra.mxu0 %v1345_v25 }
0x1776   :  { %1728 = vmatprep.subr.mxu0 %v1787_v3 }
0x1777   :  { %1729 = vmatpush3.msra.mxu0 %v1344_v26 }
0x1830   :  { %v1339_v28 = vpop.f32.mrf.mxu0 }
0x1831   :  { %v1340_v29 = vadd.f32 %v1474_v27, %v1339_v28 }
0x1832   :  { %v1721_v33 = vpop.f32.mrf.mxu0 }
0x1833   :  { %v1343_v7 = vmax.f32 %v1340_v29, 0.0 }
0x1835   :  { %1731 = vmatmul.mubr.msk.f32.vlgmr.msra.gmra.mxu0 %vm247_vm5, %v1343_v7 }
0x18f5   :  { %v1424_v3 = vpop.f32.mrf.mxu0 }
0x18f6   :  { %v1425_v35 = vadd.f32 %v1476_v34, %v1424_v3 }
0x18f7   :  { %v1732_v8 = vpop.f32.mrf.mxu0 }
0x18f8   :  { %v1437_v10 = vsel %vm1436_vm12, %v1425_v35, %v1430_v36 }
0x18f9   :  { %v1439_v39 = vsel %vm1438_vm13, %v1437_v10, %v1434_v37 }
0x18fa   :  { %v1441_v12 = vsel %vm1440_vm14, %v1439_v39, 0.0 }
0x18fb   :  { %1442 = vst [vmem:[%s2352_s12] sm:$0xff] %v1441_v12 }

</bundles_post_ra>
